<compile_context>
chip_gen: v7x
topology: tpu7x:2x2x1
jax: 0.10.0
libtpu: 0.0.40
codegen_flags: <defaults>
</compile_context>

<pallas_src>
import math

import jax
import jax.numpy as jnp
from jax.experimental import pallas as pl
from jax.experimental.pallas import tpu as pltpu

NUM_LAYERS = 12  # len(self.scalar_parameters)


def _scalar_mix_pe_kernel(w_ref, layers_ref, pe_ref, out_ref):
    """One (batch-tile, seq-tile) block of the scalar mix + positional encoding.

    w_ref:      SMEM (12,)              softmax(s) * gamma * sqrt(D)  (pre-folded)
    layers_ref: VMEM (12, tb, tl, D)    stacked BERT layer activations (native layout)
    pe_ref:     VMEM (tl, D)            sinusoidal positional-encoding slice
    out_ref:    VMEM (tl, tb*D)         lane-fused output slab (reshaped to (L,B,D) outside)
    """
    tb = layers_ref.shape[1]
    D = layers_ref.shape[3]
    pe = pe_ref[...]
    for b in range(tb):
        # Two partial accumulators -> shorter VALU dependency chain.
        acc0 = w_ref[0] * layers_ref[0, b].astype(jnp.float32)
        acc1 = w_ref[1] * layers_ref[1, b].astype(jnp.float32)
        for i in range(2, NUM_LAYERS, 2):
            acc0 = acc0 + w_ref[i] * layers_ref[i, b].astype(jnp.float32)
            acc1 = acc1 + w_ref[i + 1] * layers_ref[i + 1, b].astype(jnp.float32)
        # Lane-offset store (lane dim D untouched); aligned when D % 128 == 0.
        out_ref[:, b * D:(b + 1) * D] = acc0 + acc1 + pe


def make_pe_table(max_len, dim):
    """Sinusoidal PE table, identical to PositionalEncoding.__init__ (shape (max_len, dim))."""
    assert dim % 2 == 0, "Cannot use sin/cos positional encoding with odd dim"
    position = jnp.arange(max_len, dtype=jnp.float32)[:, None]
    div_term = jnp.exp(
        jnp.arange(0, dim, 2, dtype=jnp.float32) * -(math.log(10000.0) / dim)
    )
    pe = jnp.zeros((max_len, dim), jnp.float32)
    pe = pe.at[:, 0::2].set(jnp.sin(position * div_term))
    pe = pe.at[:, 1::2].set(jnp.cos(position * div_term))
    return pe


def _pick_tiles(B, L, D, layer_itemsize, vmem_budget_bytes, min_steps=4):
    """Pick (tb, tl): batch tile and seq tile (multiple of 8).

    Accounts for double-buffered input/output/pe blocks plus f32 accumulator /
    upcast scratch.  Prefers tb == B; shrinks the batch tile only if even a
    tl=8 block would blow the budget.  Then targets >= min_steps seq grid
    steps when L allows (v7x megacore pipelining)."""
    l_pad = -(-L // 8) * 8

    def per_row(tb):
        return (2 * (NUM_LAYERS * tb * D * layer_itemsize   # layer reads (dbl-buf)
                     + tb * D * 4                           # f32 output (dbl-buf)
                     + D * 4)                               # pe slice   (dbl-buf)
                + 4 * D * 4)                                # f32 acc/upcast scratch

    tb = B
    if 8 * per_row(B) > vmem_budget_bytes:
        for cand in range(B - 1, 0, -1):
            if (B % cand == 0 and (cand * D) % 128 == 0
                    and 8 * per_row(cand) <= vmem_budget_bytes):
                tb = cand
                break

    tl = max(8, (vmem_budget_bytes // per_row(tb)) // 8 * 8)
    tl = min(tl, l_pad)
    if l_pad >= min_steps * 8:
        target = min_steps
    elif l_pad >= 16:
        target = 2
    else:
        target = 1
    if target > 1:
        tl = min(tl, (-(-l_pad // target) + 7) // 8 * 8)
    return int(tb), int(tl)


def bert_embeddings_forward(layers_nbld, scalar_params, gamma, pe_table, *,
                            tb=None, tl=None, vmem_budget_bytes=None):
    """layers_nbld: (12, B, L, D) bf16 (preferred) or f32.  Returns (L, B, D) f32."""
    n, B, L, D = layers_nbld.shape
    assert n == NUM_LAYERS

    # Generation-aware VMEM sizing (64 MiB/TC on v7x vs 128 MiB on v5e/v6e).
    try:
        phys_vmem = int(getattr(pltpu.get_tpu_info(), "vmem_capacity_bytes", 64 << 20))
    except Exception:  # pragma: no cover - conservative fallback
        phys_vmem = 64 << 20
    if vmem_budget_bytes is None:
        vmem_budget_bytes = phys_vmem // 2

    itemsize = jnp.dtype(layers_nbld.dtype).itemsize
    auto_tb, auto_tl = _pick_tiles(B, L, D, itemsize, vmem_budget_bytes)
    if tb is None:
        tb = auto_tb
    if tl is None:
        tl = auto_tl

    # Glue (scalar-only): fold gamma and sqrt(D) into the 12 softmax weights.
    w = (jax.nn.softmax(scalar_params.astype(jnp.float32))
         * gamma.astype(jnp.float32)[0]
         * jnp.float32(math.sqrt(D)))                                # (12,)
    pe = pe_table[:L].astype(jnp.float32)                            # (L, D)

    # Explicit VMEM limit: double-buffered working set + headroom, capped under
    # physical VMEM (stays valid on v7x even with caller-provided tiles).
    block_bytes = (NUM_LAYERS * tb * tl * D * itemsize
                   + tl * tb * D * 4 + tl * D * 4)
    vmem_limit = int(max(16 << 20,
                         min(phys_vmem - (8 << 20), 2 * block_bytes + (4 << 20))))

    grid = (pl.cdiv(B, tb), pl.cdiv(L, tl))

    out_fused = pl.pallas_call(
        _scalar_mix_pe_kernel,
        out_shape=jax.ShapeDtypeStruct((L, B * D), jnp.float32),
        grid_spec=pl.GridSpec(
            grid=grid,
            in_specs=[
                pl.BlockSpec(memory_space=pltpu.MemorySpace.SMEM),      # w (12,)
                pl.BlockSpec((NUM_LAYERS, tb, tl, D),
                             lambda bi, li: (0, bi, li, 0)),            # layers, native layout
                pl.BlockSpec((tl, D), lambda bi, li: (li, 0)),          # pe slice
            ],
            out_specs=pl.BlockSpec((tl, tb * D), lambda bi, li: (li, bi)),
        ),
        compiler_params=pltpu.CompilerParams(
            dimension_semantics=("parallel", "parallel"),
            vmem_limit_bytes=vmem_limit,
        ),
    )(w, layers_nbld, pe)

    # Module contract is (L, B, D); this reshape is row-major-preserving (free).
    return out_fused.reshape(L, B, D)


def _reference(layers_nbld, scalar_params, gamma, pe_table):
    """Pure-JAX reference mirroring the PyTorch forward semantics."""
    layers_f32 = layers_nbld.astype(jnp.float32)
    w = jax.nn.softmax(scalar_params.astype(jnp.float32))
    mixed = jnp.sum(w[:, None, None, None] * layers_f32, axis=0)      # (B, L, D)
    src = gamma[0] * jnp.transpose(mixed, (1, 0, 2))                  # (L, B, D)
    L, _, D = src.shape
    return src * math.sqrt(D) + pe_table[:L][:, None, :]


if __name__ == "__main__":
    B, L, D = 2, 16, 128         # small batch/seq; lane-dense hidden size
    MAX_LEN = 64

    key = jax.random.PRNGKey(0)
    # Synthesized stand-in for BERT's 12 encoded_layers, stacked as (12, B, L, D).
    layers_f32 = jax.random.normal(key, (NUM_LAYERS, B, L, D), dtype=jnp.float32)
    # Feed the dominant 12-layer tensor as bf16 (halves HBM read bytes); the
    # kernel upcasts to f32 before accumulating.
    layers = layers_f32.astype(jnp.bfloat16)

    # Parameters initialized exactly as in __init__: 12 scalars at 0.0, gamma = 1.0.
    scalar_params = jnp.zeros((NUM_LAYERS,), dtype=jnp.float32)
    gamma = jnp.ones((1,), dtype=jnp.float32)

    pe_table = make_pe_table(MAX_LEN, D)

    out = bert_embeddings_forward(layers, scalar_params, gamma, pe_table)
    out = jax.block_until_ready(out)

    ref = _reference(layers, scalar_params, gamma, pe_table)
    assert out.shape == (L, B, D)
    assert jnp.allclose(out, ref, atol=1e-4, rtol=1e-4), \
        float(jnp.max(jnp.abs(out - ref)))

    print("KERNEL_OK")
</pallas_src>

<mosaic_0001>
module attributes {stable_mosaic.version = 11 : i64} {
  func.func @_scalar_mix_pe_kernel(%arg0: i32, %arg1: i32, %arg2: memref<12xf32, #tpu.memory_space<smem>>, %arg3: memref<12x2x8x128xbf16, #tpu.memory_space<vmem>>, %arg4: memref<8x128xf32, #tpu.memory_space<vmem>>, %arg5: memref<8x256xf32, #tpu.memory_space<vmem>>) attributes {dimension_semantics = [#tpu.dimension_semantics<parallel>, #tpu.dimension_semantics<parallel>], iteration_bounds = array<i64: 1, 2>, scalar_prefetch = 0 : i64, scratch_operands = 0 : i64, tpu.core_type = #tpu.core_type<tc>, window_params = [{transform_indices = @transform_0, window_bounds = array<i64: 12>}, {transform_indices = @transform_1, window_bounds = array<i64: 12, 2, 8, 128>}, {transform_indices = @transform_2, window_bounds = array<i64: 8, 128>}, {transform_indices = @transform_3, window_bounds = array<i64: 8, 256>}]} {
    %c0 = arith.constant 0 : index
    %c0_0 = arith.constant 0 : index
    %0 = vector.load %arg4[%c0, %c0_0] : memref<8x128xf32, #tpu.memory_space<vmem>>, vector<8x128xf32>
    %c0_1 = arith.constant 0 : index
    %1 = memref.load %arg2[%c0_1] : memref<12xf32, #tpu.memory_space<smem>>
    %c0_2 = arith.constant 0 : index
    %c0_3 = arith.constant 0 : index
    %c0_4 = arith.constant 0 : index
    %c0_5 = arith.constant 0 : index
    %2 = vector.load %arg3[%c0_2, %c0_3, %c0_4, %c0_5] : memref<12x2x8x128xbf16, #tpu.memory_space<vmem>>, vector<1x1x8x128xbf16>
    %3 = vector.shape_cast %2 : vector<1x1x8x128xbf16> to vector<8x128xbf16>
    %4 = arith.extf %3 : vector<8x128xbf16> to vector<8x128xf32>
    %5 = vector.broadcast %1 : f32 to vector<8x128xf32>
    %6 = arith.mulf %5, %4 : vector<8x128xf32>
    %c1 = arith.constant 1 : index
    %7 = memref.load %arg2[%c1] : memref<12xf32, #tpu.memory_space<smem>>
    %c1_6 = arith.constant 1 : index
    %c0_7 = arith.constant 0 : index
    %c0_8 = arith.constant 0 : index
    %c0_9 = arith.constant 0 : index
    %8 = vector.load %arg3[%c1_6, %c0_7, %c0_8, %c0_9] : memref<12x2x8x128xbf16, #tpu.memory_space<vmem>>, vector<1x1x8x128xbf16>
    %9 = vector.shape_cast %8 : vector<1x1x8x128xbf16> to vector<8x128xbf16>
    %10 = arith.extf %9 : vector<8x128xbf16> to vector<8x128xf32>
    %11 = vector.broadcast %7 : f32 to vector<8x128xf32>
    %12 = arith.mulf %11, %10 : vector<8x128xf32>
    %c2 = arith.constant 2 : index
    %13 = memref.load %arg2[%c2] : memref<12xf32, #tpu.memory_space<smem>>
    %c2_10 = arith.constant 2 : index
    %c0_11 = arith.constant 0 : index
    %c0_12 = arith.constant 0 : index
    %c0_13 = arith.constant 0 : index
    %14 = vector.load %arg3[%c2_10, %c0_11, %c0_12, %c0_13] : memref<12x2x8x128xbf16, #tpu.memory_space<vmem>>, vector<1x1x8x128xbf16>
    %15 = vector.shape_cast %14 : vector<1x1x8x128xbf16> to vector<8x128xbf16>
    %16 = arith.extf %15 : vector<8x128xbf16> to vector<8x128xf32>
    %17 = vector.broadcast %13 : f32 to vector<8x128xf32>
    %18 = arith.mulf %17, %16 : vector<8x128xf32>
    %19 = arith.addf %6, %18 : vector<8x128xf32>
    %c3 = arith.constant 3 : index
    %20 = memref.load %arg2[%c3] : memref<12xf32, #tpu.memory_space<smem>>
    %c3_14 = arith.constant 3 : index
    %c0_15 = arith.constant 0 : index
    %c0_16 = arith.constant 0 : index
    %c0_17 = arith.constant 0 : index
    %21 = vector.load %arg3[%c3_14, %c0_15, %c0_16, %c0_17] : memref<12x2x8x128xbf16, #tpu.memory_space<vmem>>, vector<1x1x8x128xbf16>
    %22 = vector.shape_cast %21 : vector<1x1x8x128xbf16> to vector<8x128xbf16>
    %23 = arith.extf %22 : vector<8x128xbf16> to vector<8x128xf32>
    %24 = vector.broadcast %20 : f32 to vector<8x128xf32>
    %25 = arith.mulf %24, %23 : vector<8x128xf32>
    %26 = arith.addf %12, %25 : vector<8x128xf32>
    %c4 = arith.constant 4 : index
    %27 = memref.load %arg2[%c4] : memref<12xf32, #tpu.memory_space<smem>>
    %c4_18 = arith.constant 4 : index
    %c0_19 = arith.constant 0 : index
    %c0_20 = arith.constant 0 : index
    %c0_21 = arith.constant 0 : index
    %28 = vector.load %arg3[%c4_18, %c0_19, %c0_20, %c0_21] : memref<12x2x8x128xbf16, #tpu.memory_space<vmem>>, vector<1x1x8x128xbf16>
    %29 = vector.shape_cast %28 : vector<1x1x8x128xbf16> to vector<8x128xbf16>
    %30 = arith.extf %29 : vector<8x128xbf16> to vector<8x128xf32>
    %31 = vector.broadcast %27 : f32 to vector<8x128xf32>
    %32 = arith.mulf %31, %30 : vector<8x128xf32>
    %33 = arith.addf %19, %32 : vector<8x128xf32>
    %c5 = arith.constant 5 : index
    %34 = memref.load %arg2[%c5] : memref<12xf32, #tpu.memory_space<smem>>
    %c5_22 = arith.constant 5 : index
    %c0_23 = arith.constant 0 : index
    %c0_24 = arith.constant 0 : index
    %c0_25 = arith.constant 0 : index
    %35 = vector.load %arg3[%c5_22, %c0_23, %c0_24, %c0_25] : memref<12x2x8x128xbf16, #tpu.memory_space<vmem>>, vector<1x1x8x128xbf16>
    %36 = vector.shape_cast %35 : vector<1x1x8x128xbf16> to vector<8x128xbf16>
    %37 = arith.extf %36 : vector<8x128xbf16> to vector<8x128xf32>
    %38 = vector.broadcast %34 : f32 to vector<8x128xf32>
    %39 = arith.mulf %38, %37 : vector<8x128xf32>
    %40 = arith.addf %26, %39 : vector<8x128xf32>
    %c6 = arith.constant 6 : index
    %41 = memref.load %arg2[%c6] : memref<12xf32, #tpu.memory_space<smem>>
    %c6_26 = arith.constant 6 : index
    %c0_27 = arith.constant 0 : index
    %c0_28 = arith.constant 0 : index
    %c0_29 = arith.constant 0 : index
    %42 = vector.load %arg3[%c6_26, %c0_27, %c0_28, %c0_29] : memref<12x2x8x128xbf16, #tpu.memory_space<vmem>>, vector<1x1x8x128xbf16>
    %43 = vector.shape_cast %42 : vector<1x1x8x128xbf16> to vector<8x128xbf16>
    %44 = arith.extf %43 : vector<8x128xbf16> to vector<8x128xf32>
    %45 = vector.broadcast %41 : f32 to vector<8x128xf32>
    %46 = arith.mulf %45, %44 : vector<8x128xf32>
    %47 = arith.addf %33, %46 : vector<8x128xf32>
    %c7 = arith.constant 7 : index
    %48 = memref.load %arg2[%c7] : memref<12xf32, #tpu.memory_space<smem>>
    %c7_30 = arith.constant 7 : index
    %c0_31 = arith.constant 0 : index
    %c0_32 = arith.constant 0 : index
    %c0_33 = arith.constant 0 : index
    %49 = vector.load %arg3[%c7_30, %c0_31, %c0_32, %c0_33] : memref<12x2x8x128xbf16, #tpu.memory_space<vmem>>, vector<1x1x8x128xbf16>
    %50 = vector.shape_cast %49 : vector<1x1x8x128xbf16> to vector<8x128xbf16>
    %51 = arith.extf %50 : vector<8x128xbf16> to vector<8x128xf32>
    %52 = vector.broadcast %48 : f32 to vector<8x128xf32>
    %53 = arith.mulf %52, %51 : vector<8x128xf32>
    %54 = arith.addf %40, %53 : vector<8x128xf32>
    %c8 = arith.constant 8 : index
    %55 = memref.load %arg2[%c8] : memref<12xf32, #tpu.memory_space<smem>>
    %c8_34 = arith.constant 8 : index
    %c0_35 = arith.constant 0 : index
    %c0_36 = arith.constant 0 : index
    %c0_37 = arith.constant 0 : index
    %56 = vector.load %arg3[%c8_34, %c0_35, %c0_36, %c0_37] : memref<12x2x8x128xbf16, #tpu.memory_space<vmem>>, vector<1x1x8x128xbf16>
    %57 = vector.shape_cast %56 : vector<1x1x8x128xbf16> to vector<8x128xbf16>
    %58 = arith.extf %57 : vector<8x128xbf16> to vector<8x128xf32>
    %59 = vector.broadcast %55 : f32 to vector<8x128xf32>
    %60 = arith.mulf %59, %58 : vector<8x128xf32>
    %61 = arith.addf %47, %60 : vector<8x128xf32>
    %c9 = arith.constant 9 : index
    %62 = memref.load %arg2[%c9] : memref<12xf32, #tpu.memory_space<smem>>
    %c9_38 = arith.constant 9 : index
    %c0_39 = arith.constant 0 : index
    %c0_40 = arith.constant 0 : index
    %c0_41 = arith.constant 0 : index
    %63 = vector.load %arg3[%c9_38, %c0_39, %c0_40, %c0_41] : memref<12x2x8x128xbf16, #tpu.memory_space<vmem>>, vector<1x1x8x128xbf16>
    %64 = vector.shape_cast %63 : vector<1x1x8x128xbf16> to vector<8x128xbf16>
    %65 = arith.extf %64 : vector<8x128xbf16> to vector<8x128xf32>
    %66 = vector.broadcast %62 : f32 to vector<8x128xf32>
    %67 = arith.mulf %66, %65 : vector<8x128xf32>
    %68 = arith.addf %54, %67 : vector<8x128xf32>
    %c10 = arith.constant 10 : index
    %69 = memref.load %arg2[%c10] : memref<12xf32, #tpu.memory_space<smem>>
    %c10_42 = arith.constant 10 : index
    %c0_43 = arith.constant 0 : index
    %c0_44 = arith.constant 0 : index
    %c0_45 = arith.constant 0 : index
    %70 = vector.load %arg3[%c10_42, %c0_43, %c0_44, %c0_45] : memref<12x2x8x128xbf16, #tpu.memory_space<vmem>>, vector<1x1x8x128xbf16>
    %71 = vector.shape_cast %70 : vector<1x1x8x128xbf16> to vector<8x128xbf16>
    %72 = arith.extf %71 : vector<8x128xbf16> to vector<8x128xf32>
    %73 = vector.broadcast %69 : f32 to vector<8x128xf32>
    %74 = arith.mulf %73, %72 : vector<8x128xf32>
    %75 = arith.addf %61, %74 : vector<8x128xf32>
    %c11 = arith.constant 11 : index
    %76 = memref.load %arg2[%c11] : memref<12xf32, #tpu.memory_space<smem>>
    %c11_46 = arith.constant 11 : index
    %c0_47 = arith.constant 0 : index
    %c0_48 = arith.constant 0 : index
    %c0_49 = arith.constant 0 : index
    %77 = vector.load %arg3[%c11_46, %c0_47, %c0_48, %c0_49] : memref<12x2x8x128xbf16, #tpu.memory_space<vmem>>, vector<1x1x8x128xbf16>
    %78 = vector.shape_cast %77 : vector<1x1x8x128xbf16> to vector<8x128xbf16>
    %79 = arith.extf %78 : vector<8x128xbf16> to vector<8x128xf32>
    %80 = vector.broadcast %76 : f32 to vector<8x128xf32>
    %81 = arith.mulf %80, %79 : vector<8x128xf32>
    %82 = arith.addf %68, %81 : vector<8x128xf32>
    %83 = arith.addf %75, %82 : vector<8x128xf32>
    %84 = arith.addf %83, %0 : vector<8x128xf32>
    %c0_50 = arith.constant 0 : index
    %c0_51 = arith.constant 0 : index
    %85 = vector.load %arg5[%c0_50, %c0_51] : memref<8x256xf32, #tpu.memory_space<vmem>>, vector<8x128xf32>
    tpu.vector_store %arg5[%c0_50, %c0_51], %84 {strides = array<i32>} : memref<8x256xf32, #tpu.memory_space<vmem>>, vector<8x128xf32>,
    %c0_52 = arith.constant 0 : index
    %86 = memref.load %arg2[%c0_52] : memref<12xf32, #tpu.memory_space<smem>>
    %c0_53 = arith.constant 0 : index
    %c1_54 = arith.constant 1 : index
    %c0_55 = arith.constant 0 : index
    %c0_56 = arith.constant 0 : index
    %87 = vector.load %arg3[%c0_53, %c1_54, %c0_55, %c0_56] : memref<12x2x8x128xbf16, #tpu.memory_space<vmem>>, vector<1x1x8x128xbf16>
    %88 = vector.shape_cast %87 : vector<1x1x8x128xbf16> to vector<8x128xbf16>
    %89 = arith.extf %88 : vector<8x128xbf16> to vector<8x128xf32>
    %90 = vector.broadcast %86 : f32 to vector<8x128xf32>
    %91 = arith.mulf %90, %89 : vector<8x128xf32>
    %c1_57 = arith.constant 1 : index
    %92 = memref.load %arg2[%c1_57] : memref<12xf32, #tpu.memory_space<smem>>
    %c1_58 = arith.constant 1 : index
    %c1_59 = arith.constant 1 : index
    %c0_60 = arith.constant 0 : index
    %c0_61 = arith.constant 0 : index
    %93 = vector.load %arg3[%c1_58, %c1_59, %c0_60, %c0_61] : memref<12x2x8x128xbf16, #tpu.memory_space<vmem>>, vector<1x1x8x128xbf16>
    %94 = vector.shape_cast %93 : vector<1x1x8x128xbf16> to vector<8x128xbf16>
    %95 = arith.extf %94 : vector<8x128xbf16> to vector<8x128xf32>
    %96 = vector.broadcast %92 : f32 to vector<8x128xf32>
    %97 = arith.mulf %96, %95 : vector<8x128xf32>
    %c2_62 = arith.constant 2 : index
    %98 = memref.load %arg2[%c2_62] : memref<12xf32, #tpu.memory_space<smem>>
    %c2_63 = arith.constant 2 : index
    %c1_64 = arith.constant 1 : index
    %c0_65 = arith.constant 0 : index
    %c0_66 = arith.constant 0 : index
    %99 = vector.load %arg3[%c2_63, %c1_64, %c0_65, %c0_66] : memref<12x2x8x128xbf16, #tpu.memory_space<vmem>>, vector<1x1x8x128xbf16>
    %100 = vector.shape_cast %99 : vector<1x1x8x128xbf16> to vector<8x128xbf16>
    %101 = arith.extf %100 : vector<8x128xbf16> to vector<8x128xf32>
    %102 = vector.broadcast %98 : f32 to vector<8x128xf32>
    %103 = arith.mulf %102, %101 : vector<8x128xf32>
    %104 = arith.addf %91, %103 : vector<8x128xf32>
    %c3_67 = arith.constant 3 : index
    %105 = memref.load %arg2[%c3_67] : memref<12xf32, #tpu.memory_space<smem>>
    %c3_68 = arith.constant 3 : index
    %c1_69 = arith.constant 1 : index
    %c0_70 = arith.constant 0 : index
    %c0_71 = arith.constant 0 : index
    %106 = vector.load %arg3[%c3_68, %c1_69, %c0_70, %c0_71] : memref<12x2x8x128xbf16, #tpu.memory_space<vmem>>, vector<1x1x8x128xbf16>
    %107 = vector.shape_cast %106 : vector<1x1x8x128xbf16> to vector<8x128xbf16>
    %108 = arith.extf %107 : vector<8x128xbf16> to vector<8x128xf32>
    %109 = vector.broadcast %105 : f32 to vector<8x128xf32>
    %110 = arith.mulf %109, %108 : vector<8x128xf32>
    %111 = arith.addf %97, %110 : vector<8x128xf32>
    %c4_72 = arith.constant 4 : index
    %112 = memref.load %arg2[%c4_72] : memref<12xf32, #tpu.memory_space<smem>>
    %c4_73 = arith.constant 4 : index
    %c1_74 = arith.constant 1 : index
    %c0_75 = arith.constant 0 : index
    %c0_76 = arith.constant 0 : index
    %113 = vector.load %arg3[%c4_73, %c1_74, %c0_75, %c0_76] : memref<12x2x8x128xbf16, #tpu.memory_space<vmem>>, vector<1x1x8x128xbf16>
    %114 = vector.shape_cast %113 : vector<1x1x8x128xbf16> to vector<8x128xbf16>
    %115 = arith.extf %114 : vector<8x128xbf16> to vector<8x128xf32>
    %116 = vector.broadcast %112 : f32 to vector<8x128xf32>
    %117 = arith.mulf %116, %115 : vector<8x128xf32>
    %118 = arith.addf %104, %117 : vector<8x128xf32>
    %c5_77 = arith.constant 5 : index
    %119 = memref.load %arg2[%c5_77] : memref<12xf32, #tpu.memory_space<smem>>
    %c5_78 = arith.constant 5 : index
    %c1_79 = arith.constant 1 : index
    %c0_80 = arith.constant 0 : index
    %c0_81 = arith.constant 0 : index
    %120 = vector.load %arg3[%c5_78, %c1_79, %c0_80, %c0_81] : memref<12x2x8x128xbf16, #tpu.memory_space<vmem>>, vector<1x1x8x128xbf16>
    %121 = vector.shape_cast %120 : vector<1x1x8x128xbf16> to vector<8x128xbf16>
    %122 = arith.extf %121 : vector<8x128xbf16> to vector<8x128xf32>
    %123 = vector.broadcast %119 : f32 to vector<8x128xf32>
    %124 = arith.mulf %123, %122 : vector<8x128xf32>
    %125 = arith.addf %111, %124 : vector<8x128xf32>
    %c6_82 = arith.constant 6 : index
    %126 = memref.load %arg2[%c6_82] : memref<12xf32, #tpu.memory_space<smem>>
    %c6_83 = arith.constant 6 : index
    %c1_84 = arith.constant 1 : index
    %c0_85 = arith.constant 0 : index
    %c0_86 = arith.constant 0 : index
    %127 = vector.load %arg3[%c6_83, %c1_84, %c0_85, %c0_86] : memref<12x2x8x128xbf16, #tpu.memory_space<vmem>>, vector<1x1x8x128xbf16>
    %128 = vector.shape_cast %127 : vector<1x1x8x128xbf16> to vector<8x128xbf16>
    %129 = arith.extf %128 : vector<8x128xbf16> to vector<8x128xf32>
    %130 = vector.broadcast %126 : f32 to vector<8x128xf32>
    %131 = arith.mulf %130, %129 : vector<8x128xf32>
    %132 = arith.addf %118, %131 : vector<8x128xf32>
    %c7_87 = arith.constant 7 : index
    %133 = memref.load %arg2[%c7_87] : memref<12xf32, #tpu.memory_space<smem>>
    %c7_88 = arith.constant 7 : index
    %c1_89 = arith.constant 1 : index
    %c0_90 = arith.constant 0 : index
    %c0_91 = arith.constant 0 : index
    %134 = vector.load %arg3[%c7_88, %c1_89, %c0_90, %c0_91] : memref<12x2x8x128xbf16, #tpu.memory_space<vmem>>, vector<1x1x8x128xbf16>
    %135 = vector.shape_cast %134 : vector<1x1x8x128xbf16> to vector<8x128xbf16>
    %136 = arith.extf %135 : vector<8x128xbf16> to vector<8x128xf32>
    %137 = vector.broadcast %133 : f32 to vector<8x128xf32>
    %138 = arith.mulf %137, %136 : vector<8x128xf32>
    %139 = arith.addf %125, %138 : vector<8x128xf32>
    %c8_92 = arith.constant 8 : index
    %140 = memref.load %arg2[%c8_92] : memref<12xf32, #tpu.memory_space<smem>>
    %c8_93 = arith.constant 8 : index
    %c1_94 = arith.constant 1 : index
    %c0_95 = arith.constant 0 : index
    %c0_96 = arith.constant 0 : index
    %141 = vector.load %arg3[%c8_93, %c1_94, %c0_95, %c0_96] : memref<12x2x8x128xbf16, #tpu.memory_space<vmem>>, vector<1x1x8x128xbf16>
    %142 = vector.shape_cast %141 : vector<1x1x8x128xbf16> to vector<8x128xbf16>
    %143 = arith.extf %142 : vector<8x128xbf16> to vector<8x128xf32>
    %144 = vector.broadcast %140 : f32 to vector<8x128xf32>
    %145 = arith.mulf %144, %143 : vector<8x128xf32>
    %146 = arith.addf %132, %145 : vector<8x128xf32>
    %c9_97 = arith.constant 9 : index
    %147 = memref.load %arg2[%c9_97] : memref<12xf32, #tpu.memory_space<smem>>
    %c9_98 = arith.constant 9 : index
    %c1_99 = arith.constant 1 : index
    %c0_100 = arith.constant 0 : index
    %c0_101 = arith.constant 0 : index
    %148 = vector.load %arg3[%c9_98, %c1_99, %c0_100, %c0_101] : memref<12x2x8x128xbf16, #tpu.memory_space<vmem>>, vector<1x1x8x128xbf16>
    %149 = vector.shape_cast %148 : vector<1x1x8x128xbf16> to vector<8x128xbf16>
    %150 = arith.extf %149 : vector<8x128xbf16> to vector<8x128xf32>
    %151 = vector.broadcast %147 : f32 to vector<8x128xf32>
    %152 = arith.mulf %151, %150 : vector<8x128xf32>
    %153 = arith.addf %139, %152 : vector<8x128xf32>
    %c10_102 = arith.constant 10 : index
    %154 = memref.load %arg2[%c10_102] : memref<12xf32, #tpu.memory_space<smem>>
    %c10_103 = arith.constant 10 : index
    %c1_104 = arith.constant 1 : index
    %c0_105 = arith.constant 0 : index
    %c0_106 = arith.constant 0 : index
    %155 = vector.load %arg3[%c10_103, %c1_104, %c0_105, %c0_106] : memref<12x2x8x128xbf16, #tpu.memory_space<vmem>>, vector<1x1x8x128xbf16>
    %156 = vector.shape_cast %155 : vector<1x1x8x128xbf16> to vector<8x128xbf16>
    %157 = arith.extf %156 : vector<8x128xbf16> to vector<8x128xf32>
    %158 = vector.broadcast %154 : f32 to vector<8x128xf32>
    %159 = arith.mulf %158, %157 : vector<8x128xf32>
    %160 = arith.addf %146, %159 : vector<8x128xf32>
    %c11_107 = arith.constant 11 : index
    %161 = memref.load %arg2[%c11_107] : memref<12xf32, #tpu.memory_space<smem>>
    %c11_108 = arith.constant 11 : index
    %c1_109 = arith.constant 1 : index
    %c0_110 = arith.constant 0 : index
    %c0_111 = arith.constant 0 : index
    %162 = vector.load %arg3[%c11_108, %c1_109, %c0_110, %c0_111] : memref<12x2x8x128xbf16, #tpu.memory_space<vmem>>, vector<1x1x8x128xbf16>
    %163 = vector.shape_cast %162 : vector<1x1x8x128xbf16> to vector<8x128xbf16>
    %164 = arith.extf %163 : vector<8x128xbf16> to vector<8x128xf32>
    %165 = vector.broadcast %161 : f32 to vector<8x128xf32>
    %166 = arith.mulf %165, %164 : vector<8x128xf32>
    %167 = arith.addf %153, %166 : vector<8x128xf32>
    %168 = arith.addf %160, %167 : vector<8x128xf32>
    %169 = arith.addf %168, %0 : vector<8x128xf32>
    %c0_112 = arith.constant 0 : index
    %c128 = arith.constant 128 : index
    %170 = vector.load %arg5[%c0_112, %c128] : memref<8x256xf32, #tpu.memory_space<vmem>>, vector<8x128xf32>
    tpu.vector_store %arg5[%c0_112, %c128], %169 {strides = array<i32>} : memref<8x256xf32, #tpu.memory_space<vmem>>, vector<8x128xf32>,
    return
  }
  func.func @transform_0(%arg0: i32, %arg1: i32) -> i32 {
    %c0_i32 = arith.constant 0 : i32
    %c0_i32_0 = arith.constant 0 : i32
    return %c0_i32 : i32
  }
  func.func @transform_1(%arg0: i32, %arg1: i32) -> (i32, i32, i32, i32) {
    %c0_i32 = arith.constant 0 : i32
    %c0_i32_0 = arith.constant 0 : i32
    %c0_i32_1 = arith.constant 0 : i32
    return %c0_i32, %arg0, %arg1, %c0_i32_0 : i32, i32, i32, i32
  }
  func.func @transform_2(%arg0: i32, %arg1: i32) -> (i32, i32) {
    %c0_i32 = arith.constant 0 : i32
    %c0_i32_0 = arith.constant 0 : i32
    return %arg1, %c0_i32 : i32, i32
  }
  func.func @transform_3(%arg0: i32, %arg1: i32) -> (i32, i32) {
    %c0_i32 = arith.constant 0 : i32
    return %arg1, %arg0 : i32, i32
  }
}

</mosaic_0001>

<bundles_post_ra>
// kernel: tpu_custom_call.1
= control target key start
LH: loop header
LB: loop body
LE: loop exit
PB: predicated region body
PF: predicated region fallthrough
CT: control target
= control target key end

     0   :  { %s1230_s0 = inlined_call_operand.hbm [shape: f32[12], index: 0, kind: input, shape index: {}]   ;;  %s1231_s1 = inlined_call_operand.hbm [shape: bf16[12,2,16,128], index: 1, kind: input, shape index: {}]   ;;  %s1232_s2 = inlined_call_operand.hbm [shape: f32[16,128], index: 2, kind: input, shape index: {}]   ;;  %s1233_s3 = inlined_call_operand.hbm [shape: f32[16,256], index: 3, kind: output, shape index: {}]  }
   0x1   :  { %1240 = sst [smem:[#allocation15_spill]] %s1230_s0 }
   0x2   :  { %1241 = sst [smem:[#allocation16_spill]] %s1231_s1 }
   0x3   :  { %8 = vsyncpa [#allocation5], 0 }
   0x4   :  { %9 = vsyncpa [#allocation3], 0 }
   0x5   :  { %11 = vsyncpa [#allocation3 + $0x1], 0 }
   0x6   :  { %12 = vsyncpa [#allocation8], 0 }
   0x7   :  { %14 = vsyncpa [#allocation8 + $0x1], 0 }
   0x8   :  { %15 = vsyncpa [#allocation4], 0 }
   0x9   :  { %17 = vsyncpa [#allocation4 + $0x1], 0  ;;  %s901_s12 = smov 0   ;;  %s903_s13 = smov 0  }
   0xa   :  { %s905_s14 = smov 0   ;;  %s907_s15 = smov 0  }
   0xb   :  { %s909_s16 = smov 0   ;;  %s911_s17 = smov 0  }
   0xc LB: > { %s563_s18 = sadd.s32 4294967295, %s872_s17   ;;  %s564_s19 = sadd.s32 4294967294, %s872_s17   ;;  %s872_s17 = sphi %s911_s17, %s23_s17   ;;  %s868_s16 = sphi %s909_s16, %s1262_s16   ;;  %s864_s15 = sphi %s907_s15, %s1261_s15   ;;  %s860_s14 = sphi %s905_s14, %s1260_s14   ;;  %s856_s13 = sphi %s903_s13, %s1259_s13   ;;  %s852_s12 = sphi %s901_s12, %s1258_s12  }
   0xd   : > { %s65_s20 = sadd.s32 1, %s860_s14  ;;  %p72_p0 = scmp.ne.s32.totalorder %s860_s14, %s856_s13 }
   0xe   : > { %p73_p1 = scmp.eq.s32.totalorder %s872_s17, 0  ;;  %p78_p2 = scmp.ne.s32.totalorder %s856_s13, %s852_s12 }
   0xf   : > { %p939_p3 = scmp.eq.s32.totalorder %s563_s18, 0  ;;  %p130_p4 = scmp.eq.s32.totalorder %s563_s18, 1 }
  0x10   : > { %p74_p5 = por %p73_p1, %p72_p0  ;;  %p136_p6 = scmp.eq.s32.totalorder %s564_s19, 1 }
  0x11   : > { %s1242_s21 = scalar_select %p939_p3, 1, 0 }
  0x12   : > { %p945_p7 = por %p939_p3, %p78_p2  ;;  %p949_p8 = por %p130_p4, %p72_p0 }
  0x13   : > { %p953_p9 = por %p136_p6, %p78_p2  ;;  %p565_p10 = scmp.ge.s32.totalorder %s872_s17, 1 }
  0x14   : > { %s1243_s22 = scalar_select %p945_p7, 1, 0 }
  0x15   : > { %s1244_s23 = scalar_select %p949_p8, 1, 0 }
  0x16   : > { %s1245_s24 = scalar_select %p953_p9, 1, 0 }
  0x17   : > { %p143_p11 = scmp.lt.s32.totalorder %s872_s17, 3  ;;  %p654_p1 = scmp.lt.s32.totalorder %s872_s17, 2 }
  0x18   : > { %s966_s26 = sand.u32 1, %s860_s14   ;;  %s32_s28 = sadd.s32 1, %s868_s16 }
  0x19   : > { %p960_p13 = pnand %p565_p10, %p143_p11  ;;  %p970_p4 = pnand %p654_p1, %p74_p5 }
  0x1a   : > { %s626_s29 = smul.u32 96, %s966_s26  ;;  %p33_p6 = scmp.ge.s32.totalorder %s32_s28, 2 }
  0x1b   : > { %s1246_s25 = scalar_select %p960_p13, 1, 0 }
  0x1c   : > { %p638_p0 = pneg %p960_p13  ;;  %s1248_s0 = sld [smem:[#allocation15_spill]] }
  0x1e   : > { %p639_p2 = pnand %p638_p0, %p939_p3 }
  0x20   : > { %p711_p11 = pneg %p639_p2 }
  0x22   : > { %s709_s5 = scalar_lea.hbm %s1248_s0, 16 }
  0x23   : > { %p710_p10 = scmp.ne.s32.totalorder %s1248_s0, %s709_s5  ;;  %p716_p5 = scmp.lt.u32.totalorder %s709_s5, %s1248_s0 }
  0x25   : > { %p712_p12 = pnand %p711_p11, %p710_p10 }
  0x27   : > { %p713_p9 = pneg %p712_p12 }
  0x29   : > { %p718_p1 = pnand %p716_p5, %p713_p9 }
  0x2b   : > { %721 = shalt.err (!%p718_p1)
}
  0x2c   : > { %s874_s10 = smov [#allocation2]   ;;  %s1264_s28 = smov (%p33_p6, %s32_s28), 0 }
  0x2d   : > { %641 = dma.hbm_to_smem (!%p639_p2), %s1248_s0, 16, %s874_s10, [#allocation5]  }
  0x2e   : > { %1249 = sst [smem:[#allocation14_spill]] %s1264_s28  ;;  %s568_s19 = sshll.u32 %s868_s16, 6 }
  0x2f   : > { %s61_s30 = ssub.s32 %s868_s16, %s1264_s28  ;;  %s1250_s1 = sld [smem:[#allocation16_spill]] }
  0x30   : > { %p63_p9 = scmp.eq.s32.totalorder %s61_s30, 0  ;;  %s169_s7 = scalar_lea.vmem [#allocation6], %s626_s29 }
  0x31   : > { %s178_s8 = sshll.u32 %s169_s7, 4  ;;  %s166_s10 = scalar_lea.sflag [#allocation3], %s966_s26  ;;  %s1000_s8 = int_to_ptr.vmem [resolvable:$true] %s178_s8 }
  0x32   : > { %s1005_s9 = scalar_select %p63_p9, %s860_s14, %s65_s20  }
  0x33   : > { %p724_p0 = pneg %p970_p4 }
  0x35   : > { %s998_s6 = scalar_lea.hbm %s1250_s1, %s568_s19  ;;  %s727_s30 = scalar_lea.hbm %s1250_s1, 3072 }
  0x36   : > { %s722_s11 = scalar_lea.hbm %s998_s6, 1536  ;;  %p728_p10 = scmp.lt.u32.totalorder %s998_s6, %s1250_s1 }
  0x37   : > { %p723_p12 = scmp.ne.s32.totalorder %s998_s6, %s722_s11  ;;  %p729_p11 = scmp.lt.u32.totalorder %s727_s30, %s722_s11 }
  0x38   : > { %p731_p1 = scmp.lt.u32.totalorder %s722_s11, %s998_s6 }
  0x39   : > { %p725_p2 = pnand %p724_p0, %p723_p12  ;;  %p730_p5 = por %p729_p11, %p728_p10 }
  0x3b   : > { %p726_p6 = pneg %p725_p2  ;;  %p732_p9 = por %p731_p1, %p730_p5 }
  0x3d   : > { %p733_p8 = pnand %p732_p9, %p726_p6 }
  0x3f   : > { %736 = shalt.err (!%p733_p8)
}
  0x40   : > { %s737_s20 = scalar_lea.vmem %s1000_s8, 1536  ;;  %s875_s5 = smov [#allocation6]  }
  0x41   : > { %p738_p12 = scmp.ne.s32.totalorder %s1000_s8, %s737_s20  ;;  %s742_s7 = sshll.u32 %s875_s5, 4  ;;  %s743_s7 = int_to_ptr.vmem [resolvable:$false] %s742_s7 }
  0x42   : > { %s744_s18 = scalar_lea.vmem %s743_s7, 3072  ;;  %p745_p3 = scmp.lt.s32.totalorder %s1000_s8, %s743_s7 }
  0x43   : > { %p740_p2 = pnand %p738_p12, %p724_p0  ;;  %p746_p10 = scmp.lt.s32.totalorder %s744_s18, %s737_s20 }
  0x45   : > { %p741_p7 = pneg %p740_p2  ;;  %p747_p11 = por %p746_p10, %p745_p3 }
  0x47   : > { %p748_p5 = pnand %p747_p11, %p741_p7 }
  0x49   : > { %751 = shalt.err (!%p748_p5)
}
  0x4a   : > { %s876_s11 = smov 128   ;;  %s877_s19 = smov 64  }
  0x4b   : > { %s878_s30 = smov 4   ;;  %s569_s29 = sshll.u32 %s966_s26, 3 }
  0x4c   : > { %645 = dma.hbm_to_vmem [thread:$0]  (!%p970_p4), %s998_s6, 1536, %s1000_s8, %s166_s10, %s876_s11, %s877_s19, %s878_s30  }
  0x4d   : > { %s570_s4 = sshll.u32 %s868_s16, 7  ;;  %s192_s18 = scalar_lea.vmem [#allocation7], %s569_s29 }
  0x4e   : > { %s1040_s7 = scalar_lea.hbm %s1232_s2, %s570_s4  ;;  %s199_s0 = sshll.u32 %s192_s18, 4  ;;  %s200_s0 = int_to_ptr.vmem [resolvable:$true] %s199_s0 }
  0x4f   : > { %s189_s1 = scalar_lea.sflag [#allocation8], %s966_s26  ;;  %s752_s28 = scalar_lea.hbm %s1040_s7, 128 }
  0x50   : > { %p753_p3 = scmp.ne.s32.totalorder %s1040_s7, %s752_s28  ;;  %s757_s10 = scalar_lea.hbm %s1232_s2, 256 }
  0x51   : > { %p758_p6 = scmp.lt.u32.totalorder %s1040_s7, %s1232_s2  ;;  %p759_p1 = scmp.lt.u32.totalorder %s757_s10, %s752_s28 }
  0x52   : > { %p755_p7 = pnand %p753_p3, %p724_p0  ;;  %p761_p12 = scmp.lt.u32.totalorder %s752_s28, %s1040_s7 }
  0x53   : > { %p760_p9 = por %p759_p1, %p758_p6 }
  0x54   : > { %p756_p8 = pneg %p755_p7 }
  0x55   : > { %p762_p2 = por %p761_p12, %p760_p9 }
  0x57   : > { %p763_p10 = pnand %p762_p2, %p756_p8 }
  0x59   : > { %766 = shalt.err (!%p763_p10)
}
  0x5a   : > { %s767_s26 = scalar_lea.vmem %s200_s0, 128  ;;  %s879_s30 = smov [#allocation7]  }
  0x5b   : > { %p768_p11 = scmp.ne.s32.totalorder %s200_s0, %s767_s26  ;;  %s772_s29 = sshll.u32 %s879_s30, 4  ;;  %s773_s29 = int_to_ptr.vmem [resolvable:$false] %s772_s29 }
  0x5c   : > { %s774_s4 = scalar_lea.vmem %s773_s29, 256  ;;  %p775_p7 = scmp.lt.s32.totalorder %s200_s0, %s773_s29 }
  0x5d   : > { %p770_p5 = pnand %p768_p11, %p724_p0  ;;  %p776_p13 = scmp.lt.s32.totalorder %s774_s4, %s767_s26 }
  0x5f   : > { %p771_p3 = pneg %p770_p5  ;;  %p777_p1 = por %p776_p13, %p775_p7 }
  0x61   : > { %p778_p6 = pnand %p777_p1, %p771_p3 }
  0x63   : > { %781 = shalt.err (!%p778_p6)
}
  0x64   : > { %648 = dma.hbm_to_vmem [thread:$0]  (!%p970_p4), %s1040_s7, 128, %s200_s0, %s189_s1  }
  0x65   : > { %p1251_p8 = scmp.ne.s32.totalorder %s1246_s25, 0 }
  0x66   : > { %p1252_p9 = scmp.ne.s32.totalorder (!%p1251_p8), %s1242_s21, 0 }
  0x67   : > { %208 = sbr.rel (%p1251_p8) target bundleno = 165 (0xa5), region = 32 }
  0x6e   : > { %835 = dma.done.wait (%p1252_p9), [#allocation5], 16  }
  0x6f   : > { %837 = vsyncadd (%p1252_p9), [#allocation5], 4294967280  ;;  %s1069_s28 = sand.u32 1, %s856_s13   ;;  %p1253_p13 = scmp.ne.s32.totalorder %s1243_s22, 0 }
  0x70   : > { %s627_s20 = smul.u32 96, %s1069_s28  ;;  %s215_s5 = scalar_lea.sflag [#allocation3], %s1069_s28 }
  0x72   : > { %s1073_s27 = scalar_lea.vmem [#allocation6], %s627_s20 }
  0x73   : > { %839 = dma.done.wait (%p1253_p13), %s215_s5, 1536  }
  0x74   : > { %841 = vsyncadd (%p1253_p13), %s215_s5, 4294965760  ;;  %s573_s0 = sshll.u32 %s1069_s28, 3  ;;  %s224_s1 = scalar_lea.sflag [#allocation8], %s1069_s28 }
  0x75   : > { %s1081_s21 = scalar_lea.vmem [#allocation7], %s573_s0 }
  0x76   : > { %843 = dma.done.wait (%p1253_p13), %s224_s1, 128  }
  0x77   : > { %845 = vsyncadd (%p1253_p13), %s224_s1, 4294967168 }
  0x78   : > { %232 = sfence }
  0x79   : > { %s1087_s25 = sld [smem:[#allocation2]]  ;;  %v260_v0 = vld [vmem:[%s1073_s27] sm:$0xff]   ;;  %v576_v1 = vld [vmem:[%s1073_s27 + $0x8] sm:$0xff]   ;;  %s1091_s7 = sld [smem:[#allocation2 + $0x1]]  ;;  %v1094_v4 = vld [vmem:[%s1073_s27 + $0x10] sm:$0xff]  }
  0x7a   : > { %v261_v2 = vunpack.c.l.bf16 %v260_v0  ;;  %v267_v3 = vunpack.c.l.bf16 %v576_v1  ;;  %v1097_v5 = vld [vmem:[%s1073_s27 + $0x18] sm:$0xff]   ;;  %v1100_v6 = vld [vmem:[%s1073_s27 + $0x20] sm:$0xff]   ;;  %v346_v7 = vunpack.c.h.bf16 %v260_v0  ;;  %v352_v8 = vunpack.c.h.bf16 %v576_v1  ;;  %s1102_s22 = sld [smem:[#allocation2 + $0x2]]  ;;  %s1105_s18 = sld [smem:[#allocation2 + $0x3]]  ;;  %v1110_v12 = vld [vmem:[%s1073_s27 + $0x28] sm:$0xff]  }
  0x7b   : > { %v273_v9 = vunpack.c.l.bf16 %v1094_v4  ;;  %v280_v10 = vunpack.c.l.bf16 %v1097_v5  ;;  %v287_v11 = vunpack.c.l.bf16 %v1100_v6  ;;  %v1113_v13 = vld [vmem:[%s1073_s27 + $0x30] sm:$0xff]   ;;  %v358_v14 = vunpack.c.h.bf16 %v1094_v4  ;;  %s1116_s6 = sld [smem:[#allocation2 + $0x4]]  ;;  %s1118_s8 = sld [smem:[#allocation2 + $0x5]]  ;;  %v1123_v17 = vld [vmem:[%s1073_s27 + $0x38] sm:$0xff]   ;;  %v1126_v18 = vld [vmem:[%s1073_s27 + $0x40] sm:$0xff]  }
  0x7c   : > { %v294_v15 = vunpack.c.l.bf16 %v1110_v12  ;;  %v301_v16 = vunpack.c.l.bf16 %v1113_v13  ;;  %v365_v19 = vunpack.c.h.bf16 %v1097_v5  ;;  %v372_v20 = vunpack.c.h.bf16 %v1100_v6  ;;  %s1130_s10 = sld [smem:[#allocation2 + $0x6]]  ;;  %s1132_s11 = sld [smem:[#allocation2 + $0x7]]  ;;  %v1137_v23 = vld [vmem:[%s1073_s27 + $0x48] sm:$0xff]   ;;  %v1140_v24 = vld [vmem:[%s1073_s27 + $0x50] sm:$0xff]   ;;  %v1151_v29 = vld [vmem:[%s1073_s27 + $0x58] sm:$0xff]  }
  0x7d   : > { %v308_v21 = vunpack.c.l.bf16 %v1123_v17  ;;  %v315_v22 = vunpack.c.l.bf16 %v1126_v18  ;;  %v379_v25 = vunpack.c.h.bf16 %v1110_v12  ;;  %v386_v26 = vunpack.c.h.bf16 %v1113_v13  ;;  %s1144_s19 = sld [smem:[#allocation2 + $0x8]]  ;;  %s1146_s26 = sld [smem:[#allocation2 + $0x9]] }
  0x7e   : > { %v322_v27 = vunpack.c.l.bf16 %v1137_v23  ;;  %v329_v28 = vunpack.c.l.bf16 %v1140_v24  ;;  %v393_v30 = vunpack.c.h.bf16 %v1123_v17  ;;  %v400_v31 = vunpack.c.h.bf16 %v1126_v18  ;;  %s1156_s30 = sld [smem:[#allocation2 + $0xa]]  ;;  %s1158_s29 = sld [smem:[#allocation2 + $0xb]] }
  0x7f   : > { %v262_v32 = vstv %s1087_s25  ;;  %v336_v33 = vunpack.c.l.bf16 %v1151_v29  ;;  %v407_v34 = vunpack.c.h.bf16 %v1137_v23  ;;  %v414_v35 = vunpack.c.h.bf16 %v1140_v24  ;;  %s574_s4 = sshll.u32 %s1069_s28, 4  ;;  %s625_s27 = sshll.u32 %s864_s15, 8 }
  0x80   : > { %v263_v36 = vmul.f32 %v262_v32, %v261_v2  ;;  %v268_v37 = vstv %s1091_s7  ;;  %v348_v38 = vmul.f32 %v346_v7, %v262_v32  ;;  %v421_v39 = vunpack.c.h.bf16 %v1151_v29  ;;  %s255_s20 = scalar_lea.vmem [#allocation9], %s574_s4  ;;  %s429_s25 = scalar_lea.sflag [#allocation4], %s1069_s28 }
  0x81   : > { %v269_v40 = vmul.f32 %v268_v37, %v267_v3  ;;  %v274_v41 = vstv %s1102_s22  ;;  %v281_v42 = vstv %s1105_s18  ;;  %v354_v43 = vmul.f32 %v352_v8, %v268_v37  ;;  %s445_s5 = sshll.u32 %s255_s20, 4  ;;  %p1254_p0 = scmp.ne.s32.totalorder %s1244_s23, 0  ;;  %s1178_s5 = int_to_ptr.vmem [resolvable:$true] %s445_s5 }
  0x82   : > { %v275_v44 = vmul.f32 %v274_v41, %v273_v9  ;;  %v282_v45 = vmul.f32 %v281_v42, %v280_v10  ;;  %v288_v46 = vstv %s1116_s6  ;;  %v295_v47 = vstv %s1118_s8  ;;  %s782_s7 = scalar_lea.vmem %s1178_s5, 256  ;;  %s880_s15 = smov [#allocation9]  }
  0x83   : > { %v289_v48 = vmul.f32 %v288_v46, %v287_v11  ;;  %v296_v49 = vmul.f32 %v295_v47, %v294_v15  ;;  %v302_v50 = vstv %s1130_s10  ;;  %v309_v51 = vstv %s1132_s11  ;;  %p783_p4 = scmp.ne.s32.totalorder %s1178_s5, %s782_s7  ;;  %s786_s22 = sshll.u32 %s880_s15, 4  ;;  %s787_s22 = int_to_ptr.vmem [resolvable:$false] %s786_s22 }
  0x84   : > { %v276_v52 = vadd.f32 %v275_v44, %v263_v36  ;;  %v283_v53 = vadd.f32 %v282_v45, %v269_v40  ;;  %v303_v54 = vmul.f32 %v302_v50, %v301_v16  ;;  %v310_v55 = vmul.f32 %v309_v51, %v308_v21  ;;  %s788_s18 = scalar_lea.vmem %s787_s22, 512  ;;  %p789_p10 = scmp.lt.s32.totalorder %s1178_s5, %s787_s22 }
  0x85   : > { %v316_v56 = vstv %s1144_s19  ;;  %v323_v57 = vstv %s1146_s26  ;;  %v330_v58 = vstv %s1156_s30  ;;  %v337_v59 = vstv %s1158_s29  ;;  %p784_p12 = pnand %p783_p4, %p1254_p0  ;;  %p790_p11 = scmp.lt.s32.totalorder %s788_s18, %s782_s7 }
  0x86   : > { %v290_v60 = vadd.f32 %v289_v48, %v276_v52  ;;  %v297_v61 = vadd.f32 %v296_v49, %v283_v53  ;;  %v317_v62 = vmul.f32 %v316_v56, %v315_v22  ;;  %v324_v63 = vmul.f32 %v323_v57, %v322_v27 }
  0x87   : > { %v331_v0 = vmul.f32 %v330_v58, %v329_v28  ;;  %v338_v1 = vmul.f32 %v337_v59, %v336_v33  ;;  %v360_v2 = vmul.f32 %v358_v14, %v274_v41  ;;  %v367_v3 = vmul.f32 %v365_v19, %v281_v42  ;;  %v258_v19 = vld [vmem:[%s1081_s21] sm:$0xff]  ;;  %s1183_s21 = scalar_lea.hbm %s1233_s3, %s625_s27  ;;  %p785_p2 = pneg %p784_p12 }
  0x88   : > { %v304_v4 = vadd.f32 %v303_v54, %v290_v60  ;;  %v311_v5 = vadd.f32 %v310_v55, %v297_v61  ;;  %v374_v6 = vmul.f32 %v372_v20, %v288_v46  ;;  %v381_v7 = vmul.f32 %v379_v25, %v295_v47  ;;  %p791_p5 = por %p790_p11, %p789_p10 }
  0x89   : > { %v361_v8 = vadd.f32 %v360_v2, %v348_v38  ;;  %v368_v9 = vadd.f32 %v367_v3, %v354_v43  ;;  %v388_v10 = vmul.f32 %v386_v26, %v302_v50  ;;  %v395_v11 = vmul.f32 %v393_v30, %v309_v51 }
  0x8a   : > { %v318_v12 = vadd.f32 %v317_v62, %v304_v4  ;;  %v325_v13 = vadd.f32 %v324_v63, %v311_v5  ;;  %v402_v17 = vmul.f32 %v400_v31, %v316_v56  ;;  %v409_v18 = vmul.f32 %v407_v34, %v323_v57  ;;  %p792_p3 = pnand %p791_p5, %p785_p2 }
  0x8b   : > { %v375_v15 = vadd.f32 %v374_v6, %v361_v8  ;;  %v382_v16 = vadd.f32 %v381_v7, %v368_v9  ;;  %v416_v24 = vmul.f32 %v414_v35, %v330_v58  ;;  %v423_v20 = vmul.f32 %v421_v39, %v337_v59 }
  0x8c   : > { %v332_v21 = vadd.f32 %v331_v0, %v318_v12  ;;  %v339_v14 = vadd.f32 %v338_v1, %v325_v13 }
  0x8d   : > { %v389_v22 = vadd.f32 %v388_v10, %v375_v15  ;;  %v396_v23 = vadd.f32 %v395_v11, %v382_v16 }
  0x8e   : > { %v340_v25 = vadd.f32 %v339_v14, %v332_v21 }
  0x8f   : > { %v403_v27 = vadd.f32 %v402_v17, %v389_v22  ;;  %v410_v26 = vadd.f32 %v409_v18, %v396_v23 }
  0x90   : > { %v341_v28 = vadd.f32 %v340_v25, %v258_v19 }
  0x91   : > { %v417_v29 = vadd.f32 %v416_v24, %v403_v27  ;;  %v424_v30 = vadd.f32 %v423_v20, %v410_v26 }
  0x92   : > { %342 = vst [vmem:[%s255_s20] sm:$0xff] %v341_v28 }
  0x93   : > { %v425_v31 = vadd.f32 %v424_v30, %v417_v29 }
  0x95   : > { %v426_v32 = vadd.f32 %v425_v31, %v258_v19 }
  0x97   : > { %427 = vst [vmem:[%s255_s20 + $0x8] sm:$0xff] %v426_v32 }
  0x98   : > { %795 = shalt.err (!%p792_p3)
}
  0x99   : > { %s796_s28 = scalar_lea.hbm %s1183_s21, 256  ;;  %s800_s10 = scalar_lea.hbm %s1233_s3, 512 }
  0x9a   : > { %p797_p7 = scmp.ne.s32.totalorder %s1183_s21, %s796_s28  ;;  %p801_p8 = scmp.lt.u32.totalorder %s1183_s21, %s1233_s3 }
  0x9b   : > { %p802_p9 = scmp.lt.u32.totalorder %s800_s10, %s796_s28  ;;  %p804_p4 = scmp.lt.u32.totalorder %s796_s28, %s1183_s21 }
  0x9c   : > { %p798_p1 = pnand %p797_p7, %p1254_p0 }
  0x9d   : > { %p803_p13 = por %p802_p9, %p801_p8 }
  0x9e   : > { %p799_p6 = pneg %p798_p1 }
  0x9f   : > { %p805_p12 = por %p804_p4, %p803_p13 }
  0xa1   : > { %p806_p2 = pnand %p805_p12, %p799_p6 }
  0xa3   : > { %809 = shalt.err (!%p806_p2)
}
  0xa4   : > { %636 = dma.vmem_to_hbm [thread:$0]  (%p1254_p0), %s1178_s5, 256, %s1183_s21, %s429_s25  }
  0xa5 PF: > { %s457_s26 = sand.u32 1, %s852_s12   ;;  %p1255_p10 = scmp.ne.s32.totalorder %s1245_s24, 0 }
  0xa6   : > { %p1256_p11 = scmp.ge.s32.totalorder %s872_s17, 2  ;;  %s458_s30 = scalar_lea.sflag [#allocation4], %s457_s26 }
  0xa8   : > { %p650_p5 = pnand %p1256_p11, %p1255_p10 }
  0xaa   : > { %847 = dma.done.wait (!%p650_p5), %s458_s30, 256  }
  0xab   : > { %849 = vsyncadd (!%p650_p5), %s458_s30, 4294967040  ;;  %s23_s17 = sadd.s32 1, %s872_s17   ;;  %s1257_s23 = sld [smem:[#allocation14_spill]] }
  0xac   : > { %p20_p3 = scmp.ge.s32.totalorder %s23_s17, 4   ;;  %s1258_s12 = smov %s856_s13 }
  0xad   : > { %s1259_s13 = smov %s860_s14  ;;  %s1260_s14 = smov %s1005_s9 }
  0xae   : > { %s1261_s15 = smov %s868_s16  ;;  %22 = sbr.rel (!%p20_p3) target bundleno = 12 (0xc), region = 118 }
  0xb1   : > { %s1262_s16 = smov %s1257_s23 }
  0xb5   :  { %463 = vsyncpa [#allocation3], 1 }
  0xb6   :  { %465 = vsyncpa [#allocation3 + $0x1], 1 }
  0xb7   :  { %466 = vsyncpa [#allocation8], 1 }
  0xb8   :  { %468 = vsyncpa [#allocation8 + $0x1], 1 }
  0xb9   :  { %469 = vsyncpa [#allocation4], 1 }
  0xba   :  { %471 = vsyncpa [#allocation4 + $0x1], 1 }
  0xbb   :  { %472 = vsyncpa [#allocation5], 1 }
  0xbc   :  { %474 = vsyncpa [#allocation5 + $0x1], 1 }

</bundles_post_ra>
